<compile_context>
chip_gen: v6e
topology: v6e:2x2x1
jax: 0.10.0
libtpu: 0.0.40
codegen_flags: <defaults>
</compile_context>

<pallas_src>
import functools

import jax
import jax.numpy as jnp
from jax.experimental import pallas as pl
from jax.experimental.pallas import tpu as pltpu

LANES = 128
_MIB = 1024 * 1024


def _swish_kernel(x_ref, o_ref, *, compute_dtype):
    x = x_ref[...].astype(compute_dtype)
    # sigmoid(x) == 0.5 * (tanh(x/2) + 1): exactly one EUP op per element,
    # numerically stable (tanh saturates, no exp overflow), keeps the kernel
    # DMA-bound on all generations.
    sig = 0.5 * (jnp.tanh(x * 0.5) + 1.0)
    o_ref[...] = (x * sig).astype(o_ref.dtype)


def _swish_jnp(x, compute_dtype):
    # Same math as the kernel, for the (rare) <128-element tail / tiny tensors.
    xf = x.astype(compute_dtype)
    return (xf * (0.5 * (jnp.tanh(xf * 0.5) + 1.0))).astype(x.dtype)


def _min_sublanes(dtype) -> int:
    # Sublane multiple per dtype packing (f32:8, bf16/f16:16, int8/fp8:32).
    itemsize = jnp.dtype(dtype).itemsize
    return {4: 8, 2: 16, 1: 32}.get(itemsize, 8)


def _tpu_generation() -> int:
    try:
        kind = jax.devices()[0].device_kind.lower()
    except Exception:
        return 0
    for g in (7, 6, 5, 4, 3):
        if (f"v{g}" in kind) or (f"tpu{g}" in kind):
            return g
    return 0


def _hw_config():
    gen = _tpu_generation()
    if gen >= 7:
        # 3.2 TB/s per TC: bigger blocks amortize the fixed grid-step overhead.
        return dict(block_bytes=8 * _MIB, vmem_limit=40 * _MIB, bf16_compute=True)
    if gen == 6:
        return dict(block_bytes=4 * _MIB, vmem_limit=32 * _MIB, bf16_compute=True)
    # v5e and older (or unknown backend): 2 MiB blocks are already past the
    # throughput plateau; no bf16 VPU/EUP so compute in f32.
    return dict(block_bytes=2 * _MIB, vmem_limit=32 * _MIB, bf16_compute=False)


def _choose_block_rows(rows, sublanes, itemsize, block_bytes):
    # Rows-per-block ~ block_bytes, rounded down to the dtype sublane multiple.
    target_rows = max(
        sublanes, (block_bytes // (LANES * itemsize)) // sublanes * sublanes
    )
    tr = min(target_rows, rows)
    total_bytes = rows * LANES * itemsize
    # Guarantee software pipelining and a megacore-splittable grid: >= 8 grid
    # steps for anything bigger than ~0.5 MiB (grid=(1,) exposes full DMA
    # latency and leaves the second v7x TensorCore idle).
    min_steps = 8
    if total_bytes >= 512 * 1024:
        cap = -(-rows // min_steps)                  # ceil(rows / min_steps)
        cap = -(-cap // sublanes) * sublanes         # round up to sublane multiple
        tr = min(tr, cap)
    if tr < rows:
        # Blocks smaller than the full dim must be sublane-aligned; the ragged
        # last block is handled by Pallas masking (safe: purely elementwise).
        tr = max(sublanes, (tr // sublanes) * sublanes)
    return tr


def _swish_2d(x2d, compute_dtype, block_bytes, vmem_limit):
    rows, _ = x2d.shape
    dtype = x2d.dtype
    itemsize = jnp.dtype(dtype).itemsize
    sublanes = _min_sublanes(dtype)
    tr = _choose_block_rows(rows, sublanes, itemsize, block_bytes)
    grid = (pl.cdiv(rows, tr),)
    n = rows * LANES
    kernel = functools.partial(_swish_kernel, compute_dtype=compute_dtype)
    return pl.pallas_call(
        kernel,
        out_shape=jax.ShapeDtypeStruct((rows, LANES), dtype),
        grid_spec=pltpu.PrefetchScalarGridSpec(
            num_scalar_prefetch=0,
            grid=grid,
            in_specs=[pl.BlockSpec((tr, LANES), lambda i: (i, 0))],
            out_specs=pl.BlockSpec((tr, LANES), lambda i: (i, 0)),
        ),
        compiler_params=pltpu.CompilerParams(
            dimension_semantics=("parallel",),
            vmem_limit_bytes=vmem_limit,
        ),
        cost_estimate=pl.CostEstimate(
            flops=4 * n, transcendentals=n, bytes_accessed=2 * n * itemsize
        ),
    )(x2d)


def swish_v1(feat: jax.Array, *, compute_dtype=None) -> jax.Array:
    """Elementwise swish / SiLU: feat * sigmoid(feat)  (SwishV1.forward)."""
    orig_shape = feat.shape
    dtype = feat.dtype
    n = feat.size
    cfg = _hw_config()

    if compute_dtype is None:
        # bf16 compute only on chips with bf16 VPU/EUP (v6e/v7x); f32 otherwise
        # for strict parity with torch.sigmoid.
        if dtype == jnp.bfloat16 and cfg["bf16_compute"]:
            compute_dtype = jnp.bfloat16
        else:
            compute_dtype = jnp.float32

    if n == 0:
        return feat

    flat = jnp.ravel(feat)                # free: contiguous reshape
    n_main = (n // LANES) * LANES
    tail = n - n_main

    if n_main == 0:
        # Whole tensor smaller than one lane row: plain jnp, no kernel launch.
        return _swish_jnp(feat, compute_dtype)

    if tail == 0:
        x2d = flat.reshape(n_main // LANES, LANES)
        out_flat = _swish_2d(
            x2d, compute_dtype, cfg["block_bytes"], cfg["vmem_limit"]
        ).reshape(-1)
    else:
        # Rare misaligned case (n % 128 != 0): kernel on the aligned prefix and
        # fix the <128-element tail in plain jnp (no whole-tensor pad/slice).
        # TODO(synk): fully copy-free variant via scalar-prefetched n and a
        # masked store on the last block.
        x2d = flat[:n_main].reshape(n_main // LANES, LANES)
        out_main = _swish_2d(
            x2d, compute_dtype, cfg["block_bytes"], cfg["vmem_limit"]
        ).reshape(-1)
        out_tail = _swish_jnp(flat[n_main:], compute_dtype)
        out_flat = jnp.concatenate([out_main, out_tail])

    return out_flat.reshape(orig_shape)


if __name__ == "__main__":
    key = jax.random.PRNGKey(0)
    x = jax.random.normal(key, (2, 4, 16, 16), dtype=jnp.float32)

    y = swish_v1(x)
    jax.block_until_ready(y)

    # Reference check against plain JAX swish (f32 compute path).
    y_ref = x * jax.nn.sigmoid(x)
    assert y.shape == x.shape and y.dtype == x.dtype
    assert jnp.allclose(y, y_ref, atol=1e-5, rtol=1e-5)

    # bf16 input: exercises dtype-aware tiling (and bf16 compute on v6e/v7x).
    xb = jax.random.normal(jax.random.PRNGKey(1), (4, 8, 32, 32), dtype=jnp.bfloat16)
    yb = swish_v1(xb)
    jax.block_until_ready(yb)
    yb_ref = (
        xb.astype(jnp.float32) * jax.nn.sigmoid(xb.astype(jnp.float32))
    ).astype(jnp.bfloat16)
    assert yb.dtype == xb.dtype
    assert jnp.allclose(
        yb.astype(jnp.float32), yb_ref.astype(jnp.float32), atol=2e-2, rtol=2e-2
    )

    # Misaligned total size (n % 128 != 0): exercises the prefix + tail path.
    xm = jax.random.normal(jax.random.PRNGKey(2), (5, 7, 13), dtype=jnp.float32)
    ym = swish_v1(xm)
    jax.block_until_ready(ym)
    ym_ref = xm * jax.nn.sigmoid(xm)
    assert ym.shape == xm.shape and ym.dtype == xm.dtype
    assert jnp.allclose(ym, ym_ref, atol=1e-5, rtol=1e-5)

    print("KERNEL_OK")
</pallas_src>

<mosaic_0001>
module attributes {stable_mosaic.version = 11 : i64} {
  func.func @_swish_kernel(%arg0: i32, %arg1: memref<16x128xf32, #tpu.memory_space<vmem>>, %arg2: memref<16x128xf32, #tpu.memory_space<vmem>>) attributes {dimension_semantics = [#tpu.dimension_semantics<parallel>], iteration_bounds = array<i64: 1>, scalar_prefetch = 0 : i64, scratch_operands = 0 : i64, tpu.core_type = #tpu.core_type<tc>, window_params = [{transform_indices = @transform_0, window_bounds = array<i64: 16, 128>}, {transform_indices = @transform_1, window_bounds = array<i64: 16, 128>}]} {
    %c0 = arith.constant 0 : index
    %c0_0 = arith.constant 0 : index
    %0 = vector.load %arg1[%c0, %c0_0] : memref<16x128xf32, #tpu.memory_space<vmem>>, vector<16x128xf32>
    %cst = arith.constant 5.000000e-01 : f32
    %1 = vector.broadcast %cst : f32 to vector<16x128xf32>
    %2 = arith.mulf %0, %1 : vector<16x128xf32>
    %3 = math.tanh %2 : vector<16x128xf32>
    %cst_1 = arith.constant 1.000000e+00 : f32
    %4 = vector.broadcast %cst_1 : f32 to vector<16x128xf32>
    %5 = arith.addf %3, %4 : vector<16x128xf32>
    %cst_2 = arith.constant 5.000000e-01 : f32
    %6 = vector.broadcast %cst_2 : f32 to vector<16x128xf32>
    %7 = arith.mulf %6, %5 : vector<16x128xf32>
    %8 = arith.mulf %0, %7 : vector<16x128xf32>
    %c0_3 = arith.constant 0 : index
    %c0_4 = arith.constant 0 : index
    %9 = vector.load %arg2[%c0_3, %c0_4] : memref<16x128xf32, #tpu.memory_space<vmem>>, vector<16x128xf32>
    tpu.vector_store %arg2[%c0_3, %c0_4], %8 {strides = array<i32>} : memref<16x128xf32, #tpu.memory_space<vmem>>, vector<16x128xf32>,
    return
  }
  func.func @transform_0(%arg0: i32) -> (i32, i32) {
    %c0_i32 = arith.constant 0 : i32
    %c0_i32_0 = arith.constant 0 : i32
    return %arg0, %c0_i32 : i32, i32
  }
  func.func @transform_1(%arg0: i32) -> (i32, i32) {
    %c0_i32 = arith.constant 0 : i32
    %c0_i32_0 = arith.constant 0 : i32
    return %arg0, %c0_i32 : i32, i32
  }
}

</mosaic_0001>

<bundles_post_ra>
// kernel: tpu_custom_call.1
= control target key start
LH: loop header
LB: loop body
LE: loop exit
PB: predicated region body
PF: predicated region fallthrough
CT: control target
= control target key end

     0   :  { %6 = vsyncpa [#allocation3], 0  ;;  %s132_s0 = inlined_call_operand.hbm [shape: f32[16,128], index: 0, kind: input, shape index: {}]   ;;  %s133_s1 = inlined_call_operand.hbm [shape: f32[16,128], index: 1, kind: output, shape index: {}]  }
   0x1   :  { %7 = vsyncpa [#allocation4], 0  ;;  %s106_s6 = smov [#allocation2]  }
   0x2   :  { %s13_s7 = sshll.u32 %s106_s6, 4  ;;  %s14_s7 = int_to_ptr.vmem [resolvable:$true] %s13_s7 }
   0x3   :  { %s70_s8 = scalar_lea.vmem %s14_s7, 256  ;;  %p75_p1 = scmp.lt.s32.totalorder %s14_s7, %s14_s7 }
   0x4   :  { %p71_p0 = scmp.ne.s32.totalorder %s14_s7, %s70_s8  ;;  %p76_p2 = scmp.lt.s32.totalorder %s70_s8, %s70_s8 }
   0x6   :  { %p77_p3 = por %p76_p2, %p75_p1 }
   0x8   :  { %p78_p4 = pnand %p77_p3, %p71_p0 }
   0xa   :  { %81 = shalt.err (!%p78_p4)
}
   0xb   :  { %s107_s9 = smov 128   ;;  %s108_s10 = smov 8  }
   0xc   :  { %19 = dma.hbm_to_vmem [thread:$0]  %s132_s0, 256, %s14_s7, [#allocation3], %s107_s9, %s107_s9, %s108_s10  }
   0xd   :  { %102 = dma.done.wait [#allocation3], 256  }
   0xe   :  { %103 = vsyncadd [#allocation3], 4294967040  ;;  %v23_v0 = vld [vmem:[#allocation2] sm:$0xff]  ;;  %v24_v1 = vld [vmem:[#allocation2 + $0x8] sm:$0xff]  ;;  %s109_s13 = smov [#allocation5]  }
   0xf   :  { %v25_v2 = vmul.f32 0.5, %v23_v0  ;;  %v26_v3 = vmul.f32 0.5, %v24_v1  ;;  %s42_s14 = sshll.u32 %s109_s13, 4  ;;  %s43_s14 = int_to_ptr.vmem [resolvable:$true] %s42_s14 }
  0x10   :  { %s82_s0 = scalar_lea.vmem %s43_s14, 256  ;;  %p87_p6 = scmp.lt.s32.totalorder %s43_s14, %s43_s14 }
  0x11   :  { %58 = vtanh.f32 %v25_v2  ;;  %p83_p5 = scmp.ne.s32.totalorder %s43_s14, %s82_s0  ;;  %p88_p7 = scmp.lt.s32.totalorder %s82_s0, %s82_s0 }
  0x12   :  { %60 = vtanh.f32 %v26_v3 }
  0x13   :  { %p89_p8 = por %p88_p7, %p87_p6 }
  0x15   :  { %p90_p9 = pnand %p89_p8, %p83_p5 }
  0x1e   :  { %v59_v4 = vpop.eup %58 }
  0x1f   :  { %v61_v5 = vpop.eup %60  ;;  %v29_v6 = vadd.f32 1.0, %v59_v4 }
  0x20   :  { %v30_v7 = vadd.f32 1.0, %v61_v5 }
  0x21   :  { %v31_v8 = vmul.f32 0.5, %v29_v6 }
  0x22   :  { %v32_v9 = vmul.f32 0.5, %v30_v7 }
  0x23   :  { %v33_v10 = vmul.f32 %v31_v8, %v23_v0 }
  0x24   :  { %v34_v11 = vmul.f32 %v32_v9, %v24_v1 }
  0x25   :  { %35 = vst [vmem:[#allocation5] sm:$0xff] %v33_v10 }
  0x26   :  { %36 = vst [vmem:[#allocation5 + $0x8] sm:$0xff] %v34_v11 }
  0x27   :  { %93 = shalt.err (!%p90_p9)
}
  0x28   :  { %48 = dma.vmem_to_hbm [thread:$0]  %s43_s14, 256, %s133_s1, [#allocation4], %s107_s9, %s107_s9, %s108_s10  }
  0x29   :  { %104 = dma.done.wait [#allocation4], 256  }
  0x2a   :  { %105 = vsyncadd [#allocation4], 4294967040 }
  0x2b   :  { %52 = vsyncpa [#allocation3], 1 }
  0x2c   :  { %53 = vsyncpa [#allocation4], 1 }

</bundles_post_ra>
